<compile_context>
chip_gen: v7x
topology: tpu7x:2x2x1
jax: 0.10.0
libtpu: 0.0.40
codegen_flags: <defaults>
</compile_context>

<pallas_src>
import math
import functools

import jax
import jax.numpy as jnp
from jax.experimental import pallas as pl
from jax.experimental.pallas import tpu as pltpu


def _sdpa_kernel(q_ref, k_ref, v_ref, ctx_ref, attn_ref, *, scale):
    # Block shapes: q (BB, TQ, D), k/v (BB, L, D), ctx (BB, TQ, D), attn (BB, TQ, L)
    q = q_ref[...]
    k = k_ref[...]
    v = v_ref[...]

    # Fold the 1/sqrt(d_k) scale into Q (cheaper than scaling the (TQ, L) scores).
    qs = q * jnp.asarray(scale, dtype=q.dtype)

    # scores = Q @ K^T: contract the last dims of both operands directly
    # (no explicit transpose of K); accumulate in f32 on the MXU.
    scores = jnp.einsum("bqd,bkd->bqk", qs, k,
                        preferred_element_type=jnp.float32)

    # exp with NO max-subtraction (matches the PyTorch module exactly).
    scores = jnp.exp(scores)

    # Per-row normalization: reciprocal of the (BB, TQ, 1) row-sums, then a
    # broadcast multiply over the (BB, TQ, L) tile (exact, keeps 1e-5 tol).
    denom = jnp.sum(scores, axis=-1, keepdims=True) + 1e-8
    attn = scores * (1.0 / denom)

    # context = attn @ V (attn fed in V's dtype so bf16 callers stay bf16 on MXU).
    ctx = jnp.einsum("bqk,bkd->bqd", attn.astype(v.dtype), v,
                     preferred_element_type=jnp.float32)

    ctx_ref[...] = ctx.astype(ctx_ref.dtype)
    attn_ref[...] = attn.astype(attn_ref.dtype)


def _pick_query_tile(L):
    # Largest friendly query tile that evenly divides L; fall back to full L.
    for t in (256, 128):
        if L % t == 0:
            return t
    return L


def _pick_batch_block(B, L):
    # For small L, fold several batch elements per grid step so each step
    # presents >= ~128-256 rows to the MXU / DMA engines.
    if L >= 128:
        return 1
    target = max(1, 256 // L)
    bb = 1
    for cand in range(1, B + 1):
        if B % cand == 0 and cand <= target:
            bb = cand
    return bb


def scaled_dot_product_attention(Q, K, V, d_k):
    """Q, K, V: [B, L, D]. Returns (context [B, L, D], attn [B, L, L] f32)."""
    B, L, D = Q.shape
    assert K.shape == (B, L, D) and V.shape == (B, L, D)

    TQ = _pick_query_tile(L)
    BB = _pick_batch_block(B, L) if TQ == L else 1

    kernel = functools.partial(_sdpa_kernel, scale=1.0 / math.sqrt(d_k))

    # VMEM budget estimate (double-buffered blocks) -> explicit scoped-VMEM
    # limit, clamped well under v7x's 64 MiB physical VMEM.
    in_bytes = jnp.dtype(Q.dtype).itemsize
    est = 2 * (
        BB * TQ * D * in_bytes          # Q block
        + 2 * BB * L * D * in_bytes     # K + V blocks (resident)
        + BB * TQ * D * in_bytes        # ctx block
        + BB * TQ * L * 4               # attn block (f32)
    )
    vmem_limit = int(min(max(2 * est, 16 << 20), 56 << 20))

    grid_spec = pltpu.PrefetchScalarGridSpec(
        num_scalar_prefetch=0,
        grid=(B // BB, L // TQ),
        in_specs=[
            pl.BlockSpec((BB, TQ, D), lambda b, qi: (b, qi, 0)),
            # K / V blocks depend only on the batch block index -> they are
            # NOT re-fetched as the inner query-tile axis advances.
            pl.BlockSpec((BB, L, D), lambda b, qi: (b, 0, 0)),
            pl.BlockSpec((BB, L, D), lambda b, qi: (b, 0, 0)),
        ],
        out_specs=[
            pl.BlockSpec((BB, TQ, D), lambda b, qi: (b, qi, 0)),
            pl.BlockSpec((BB, TQ, L), lambda b, qi: (b, qi, 0)),
        ],
    )

    context, attn = pl.pallas_call(
        kernel,
        grid_spec=grid_spec,
        out_shape=(
            jax.ShapeDtypeStruct((B, L, D), Q.dtype),
            jax.ShapeDtypeStruct((B, L, L), jnp.float32),
        ),
        compiler_params=pltpu.CompilerParams(
            dimension_semantics=("parallel", "parallel"),
            vmem_limit_bytes=vmem_limit,
        ),
    )(Q, K, V)
    return context, attn


def _reference(Q, K, V, d_k):
    scores = jnp.matmul(Q, jnp.swapaxes(K, -1, -2)) / math.sqrt(d_k)
    scores = jnp.exp(scores)
    attn = scores / (jnp.sum(scores, axis=-1, keepdims=True) + 1e-8)
    ctx = jnp.matmul(attn, V)
    return ctx, attn


if __name__ == "__main__":
    B, L, D = 2, 8, 32        # batch=2, seq=8, d_k=32
    key = jax.random.PRNGKey(0)
    kq, kk, kv = jax.random.split(key, 3)
    Q = jax.random.normal(kq, (B, L, D), dtype=jnp.float32)
    K = jax.random.normal(kk, (B, L, D), dtype=jnp.float32)
    V = jax.random.normal(kv, (B, L, D), dtype=jnp.float32)

    ctx, attn = scaled_dot_product_attention(Q, K, V, d_k=D)
    jax.block_until_ready((ctx, attn))

    ctx_ref, attn_ref = _reference(Q, K, V, D)
    assert jnp.allclose(ctx, ctx_ref, atol=1e-5, rtol=1e-5)
    assert jnp.allclose(attn, attn_ref, atol=1e-5, rtol=1e-5)

    print("KERNEL_OK")
</pallas_src>

<mosaic_0001>
module attributes {stable_mosaic.version = 11 : i64} {
  func.func @_sdpa_kernel(%arg0: i32, %arg1: i32, %arg2: memref<2x8x32xf32, #tpu.memory_space<vmem>>, %arg3: memref<2x8x32xf32, #tpu.memory_space<vmem>>, %arg4: memref<2x8x32xf32, #tpu.memory_space<vmem>>, %arg5: memref<2x8x32xf32, #tpu.memory_space<vmem>>, %arg6: memref<2x8x8xf32, #tpu.memory_space<vmem>>) attributes {dimension_semantics = [#tpu.dimension_semantics<parallel>, #tpu.dimension_semantics<parallel>], iteration_bounds = array<i64: 1, 1>, scalar_prefetch = 0 : i64, scratch_operands = 0 : i64, tpu.core_type = #tpu.core_type<tc>, window_params = [{transform_indices = @transform_0, window_bounds = array<i64: 2, 8, 32>}, {transform_indices = @transform_1, window_bounds = array<i64: 2, 8, 32>}, {transform_indices = @transform_2, window_bounds = array<i64: 2, 8, 32>}, {transform_indices = @transform_3, window_bounds = array<i64: 2, 8, 32>}, {transform_indices = @transform_4, window_bounds = array<i64: 2, 8, 8>}]} {
    %c0 = arith.constant 0 : index
    %c0_0 = arith.constant 0 : index
    %c0_1 = arith.constant 0 : index
    %0 = vector.load %arg2[%c0, %c0_0, %c0_1] : memref<2x8x32xf32, #tpu.memory_space<vmem>>, vector<2x8x32xf32>
    %c0_2 = arith.constant 0 : index
    %c0_3 = arith.constant 0 : index
    %c0_4 = arith.constant 0 : index
    %1 = vector.load %arg3[%c0_2, %c0_3, %c0_4] : memref<2x8x32xf32, #tpu.memory_space<vmem>>, vector<2x8x32xf32>
    %c0_5 = arith.constant 0 : index
    %c0_6 = arith.constant 0 : index
    %c0_7 = arith.constant 0 : index
    %2 = vector.load %arg4[%c0_5, %c0_6, %c0_7] : memref<2x8x32xf32, #tpu.memory_space<vmem>>, vector<2x8x32xf32>
    %cst = arith.constant 0.176776692 : f32
    %3 = vector.broadcast %cst : f32 to vector<2x8x32xf32>
    %4 = arith.mulf %0, %3 : vector<2x8x32xf32>
    "tpu.trace_start"() <{level = 10 : i32, message = "bqd,bkd->bqk"}> : () -> ()
    %cst_8 = arith.constant dense<0.000000e+00> : vector<2x8x8xf32>
    %5 = tpu.matmul %4, %1, %cst_8 {dimension_numbers = #tpu.dot_dimension_numbers<[2], [2], [1], [1], [0, 0, 0, 1, 1, 1], [0], [0]>} : vector<2x8x32xf32>, vector<2x8x32xf32>, vector<2x8x8xf32> -> vector<2x8x8xf32>
    "tpu.trace_stop"() : () -> ()
    %6 = math.exp %5 : vector<2x8x8xf32>
    %cst_9 = arith.constant dense<0.000000e+00> : vector<2x8xf32>
    %7 = vector.multi_reduction <add>, %6, %cst_9 [2] : vector<2x8x8xf32> to vector<2x8xf32>
    %8 = vector.shape_cast %7 : vector<2x8xf32> to vector<2x8x1xf32>
    %cst_10 = arith.constant 9.99999993E-9 : f32
    %9 = vector.broadcast %cst_10 : f32 to vector<2x8x1xf32>
    %10 = arith.addf %8, %9 : vector<2x8x1xf32>
    %cst_11 = arith.constant 1.000000e+00 : f32
    %11 = vector.broadcast %cst_11 : f32 to vector<2x8x1xf32>
    %12 = arith.divf %11, %10 : vector<2x8x1xf32>
    %13 = vector.broadcast %12 : vector<2x8x1xf32> to vector<2x8x8xf32>
    %14 = arith.mulf %6, %13 : vector<2x8x8xf32>
    "tpu.trace_start"() <{level = 10 : i32, message = "bqk,bkd->bqd"}> : () -> ()
    %cst_12 = arith.constant dense<0.000000e+00> : vector<2x8x32xf32>
    %15 = tpu.matmul %14, %2, %cst_12 {dimension_numbers = #tpu.dot_dimension_numbers<[2], [1], [1], [2], [0, 0, 0, 1, 1, 2], [0], [0]>} : vector<2x8x8xf32>, vector<2x8x32xf32>, vector<2x8x32xf32> -> vector<2x8x32xf32>
    "tpu.trace_stop"() : () -> ()
    %c0_13 = arith.constant 0 : index
    %c0_14 = arith.constant 0 : index
    %c0_15 = arith.constant 0 : index
    %16 = vector.load %arg5[%c0_13, %c0_14, %c0_15] : memref<2x8x32xf32, #tpu.memory_space<vmem>>, vector<2x8x32xf32>
    tpu.vector_store %arg5[%c0_13, %c0_14, %c0_15], %15 {strides = array<i32>} : memref<2x8x32xf32, #tpu.memory_space<vmem>>, vector<2x8x32xf32>,
    %c0_16 = arith.constant 0 : index
    %c0_17 = arith.constant 0 : index
    %c0_18 = arith.constant 0 : index
    %17 = vector.load %arg6[%c0_16, %c0_17, %c0_18] : memref<2x8x8xf32, #tpu.memory_space<vmem>>, vector<2x8x8xf32>
    tpu.vector_store %arg6[%c0_16, %c0_17, %c0_18], %14 {strides = array<i32>} : memref<2x8x8xf32, #tpu.memory_space<vmem>>, vector<2x8x8xf32>,
    return
  }
  func.func @transform_0(%arg0: i32, %arg1: i32) -> (i32, i32, i32) {
    %c0_i32 = arith.constant 0 : i32
    %c0_i32_0 = arith.constant 0 : i32
    return %arg0, %arg1, %c0_i32 : i32, i32, i32
  }
  func.func @transform_1(%arg0: i32, %arg1: i32) -> (i32, i32, i32) {
    %c0_i32 = arith.constant 0 : i32
    %c0_i32_0 = arith.constant 0 : i32
    %c0_i32_1 = arith.constant 0 : i32
    return %arg0, %c0_i32, %c0_i32_0 : i32, i32, i32
  }
  func.func @transform_2(%arg0: i32, %arg1: i32) -> (i32, i32, i32) {
    %c0_i32 = arith.constant 0 : i32
    %c0_i32_0 = arith.constant 0 : i32
    %c0_i32_1 = arith.constant 0 : i32
    return %arg0, %c0_i32, %c0_i32_0 : i32, i32, i32
  }
  func.func @transform_3(%arg0: i32, %arg1: i32) -> (i32, i32, i32) {
    %c0_i32 = arith.constant 0 : i32
    %c0_i32_0 = arith.constant 0 : i32
    return %arg0, %arg1, %c0_i32 : i32, i32, i32
  }
  func.func @transform_4(%arg0: i32, %arg1: i32) -> (i32, i32, i32) {
    %c0_i32 = arith.constant 0 : i32
    %c0_i32_0 = arith.constant 0 : i32
    return %arg0, %arg1, %c0_i32 : i32, i32, i32
  }
}

</mosaic_0001>

<bundles_post_ra>
// kernel: tpu_custom_call.1
= control target key start
LH: loop header
LB: loop body
LE: loop exit
PB: predicated region body
PF: predicated region fallthrough
CT: control target
= control target key end

     0   :  { %10 = vsyncpa [#allocation3], 0  ;;  %s724_s0 = inlined_call_operand.hbm [shape: f32[2,8,32], index: 0, kind: input, shape index: {}]   ;;  %s725_s1 = inlined_call_operand.hbm [shape: f32[2,8,32], index: 1, kind: input, shape index: {}]   ;;  %s726_s2 = inlined_call_operand.hbm [shape: f32[2,8,32], index: 2, kind: input, shape index: {}]   ;;  %s727_s3 = inlined_call_operand.hbm [shape: f32[2,8,32], index: 3, kind: output, shape index: {0}]   ;;  %s728_s4 = inlined_call_operand.hbm [shape: f32[2,8,8], index: 4, kind: output, shape index: {1}]  }
   0x1   :  { %11 = vsyncpa [#allocation6], 0 }
   0x2   :  { %12 = vsyncpa [#allocation4], 0 }
   0x3   :  { %13 = vsyncpa [#allocation10], 0  ;;  %s592_s15 = smov [#allocation5]   ;;  %s593_s17 = smov [#allocation2]  }
   0x4   :  { %s31_s16 = sshll.u32 %s592_s15, 4  ;;  %s19_s18 = sshll.u32 %s593_s17, 4  ;;  %s32_s16 = int_to_ptr.vmem [resolvable:$true] %s31_s16  ;;  %s626_s18 = int_to_ptr.vmem [resolvable:$true] %s19_s18 }
   0x5   :  { %s474_s21 = scalar_lea.hbm %s725_s1, 256 }
   0x6   :  { %p475_p0 = scmp.ne.s32.totalorder %s725_s1, %s474_s21  ;;  %p478_p1 = scmp.lt.u32.totalorder %s474_s21, %s725_s1 }
   0x8   :  { %p480_p2 = pnand %p478_p1, %p475_p0 }
   0xa   :  { %483 = shalt.err (!%p480_p2)
}
   0xb   :  { %s484_s26 = scalar_lea.vmem %s32_s16, 256  ;;  %p489_p4 = scmp.lt.s32.totalorder %s32_s16, %s32_s16 }
   0xc   :  { %p485_p3 = scmp.ne.s32.totalorder %s32_s16, %s484_s26  ;;  %p490_p5 = scmp.lt.s32.totalorder %s484_s26, %s484_s26 }
   0xe   :  { %p491_p6 = por %p490_p5, %p489_p4 }
  0x10   :  { %p492_p7 = pnand %p491_p6, %p485_p3 }
  0x12   :  { %495 = shalt.err (!%p492_p7)
}
  0x13   :  { %s594_s27 = smov 128   ;;  %s595_s28 = smov 8  }
  0x14   :  { %37 = dma.hbm_to_vmem [thread:$0]  %s725_s1, 256, %s32_s16, [#allocation6], %s594_s27, %s594_s27, %s595_s28  }
  0x15   :  { %s496_s7 = scalar_lea.hbm %s724_s0, 256 }
  0x16   :  { %p497_p8 = scmp.ne.s32.totalorder %s724_s0, %s496_s7  ;;  %p500_p9 = scmp.lt.u32.totalorder %s496_s7, %s724_s0 }
  0x18   :  { %p502_p10 = pnand %p500_p9, %p497_p8 }
  0x1a   :  { %505 = shalt.err (!%p502_p10)
}
  0x1b   :  { %s506_s12 = scalar_lea.vmem %s626_s18, 256  ;;  %p511_p12 = scmp.lt.s32.totalorder %s626_s18, %s626_s18 }
  0x1c   :  { %p507_p11 = scmp.ne.s32.totalorder %s626_s18, %s506_s12  ;;  %p512_p13 = scmp.lt.s32.totalorder %s506_s12, %s506_s12 }
  0x1e   :  { %p513_p0 = por %p512_p13, %p511_p12 }
  0x20   :  { %p514_p1 = pnand %p513_p0, %p507_p11 }
  0x22   :  { %517 = shalt.err (!%p514_p1)
}
  0x23   :  { %25 = dma.hbm_to_vmem [thread:$0]  %s724_s0, 256, %s626_s18, [#allocation3], %s594_s27, %s594_s27, %s595_s28  }
  0x24   :  { %s596_s14 = smov [#allocation7]   ;;  %s518_s19 = scalar_lea.hbm %s726_s2, 256 }
  0x25   :  { %s43_s15 = sshll.u32 %s596_s14, 4  ;;  %p519_p2 = scmp.ne.s32.totalorder %s726_s2, %s518_s19  ;;  %s44_s15 = int_to_ptr.vmem [resolvable:$true] %s43_s15 }
  0x26   :  { %p522_p3 = scmp.lt.u32.totalorder %s518_s19, %s726_s2 }
  0x28   :  { %p524_p4 = pnand %p522_p3, %p519_p2 }
  0x2a   :  { %527 = shalt.err (!%p524_p4)
}
  0x2b   :  { %s528_s24 = scalar_lea.vmem %s44_s15, 256  ;;  %p533_p6 = scmp.lt.s32.totalorder %s44_s15, %s44_s15 }
  0x2c   :  { %p529_p5 = scmp.ne.s32.totalorder %s44_s15, %s528_s24  ;;  %p534_p7 = scmp.lt.s32.totalorder %s528_s24, %s528_s24 }
  0x2e   :  { %p535_p8 = por %p534_p7, %p533_p6 }
  0x30   :  { %p536_p9 = pnand %p535_p8, %p529_p5 }
  0x32   :  { %539 = shalt.err (!%p536_p9)
}
  0x33   :  { %49 = dma.hbm_to_vmem [thread:$0]  %s726_s2, 256, %s44_s15, [#allocation6], %s594_s27, %s594_s27, %s595_s28  }
  0x34   :  { %584 = dma.done.wait [#allocation3], 256  }
  0x35   :  { %585 = vsyncadd [#allocation3], 4294967040 }
  0x36   :  { %586 = dma.done.wait [#allocation6], 512  }
  0x37   :  { %587 = vsyncadd [#allocation6], 4294966784  ;;  %v597_v0 = vmov 0.0   ;;  %vm598_vm0 = vmmov 0   ;;  %vm67_vm1 = vcmask 261120   ;;  %v61_v1 = vld [vmem:[#allocation5] sm:$0xff] }
  0x38   :  { %437 = vmatprep.subr.mxu0 %v597_v0  ;;  %439 = vmatprep.mubr.msk.f32.mxu0 %vm598_vm0, %v597_v0  ;;  %v59_v2 = vld [vmem:[#allocation2] sm:$0xff]  ;;  %v62_v3 = vld [vmem:[#allocation5 + $0x8] sm:$0xff]  ;;  %v60_v5 = vld [vmem:[#allocation2 + $0x8] sm:$0xff]  ;;  %vm224_vm2 = vcmask 64512   ;;  %s599_s2 = smov [#allocation9]  }
  0x39   :  { %442 = vmatprep.subr.mxu1 %v597_v0  ;;  %444 = vmatprep.mubr.msk.f32.mxu1 %vm598_vm0, %v597_v0  ;;  %v65_v4 = vmul.f32 0.17677669, %v59_v2  ;;  %v66_v6 = vmul.f32 0.17677669, %v60_v5  ;;  %v63_v17 = vld [vmem:[#allocation7] sm:$0xff]  ;;  %v64_v18 = vld [vmem:[#allocation7 + $0x8] sm:$0xff] }
  0x3a   :  { %438 = vmatpush3.xpose.msk.msra.mxu0 %vm67_vm1, %v61_v1  ;;  %443 = vmatpush3.xpose.msk.msra.mxu1 %vm67_vm1, %v62_v3  ;;  %s406_s25 = sshll.u32 %s599_s2, 4  ;;  %s407_s25 = int_to_ptr.vmem [resolvable:$true] %s406_s25 }
  0x3b   :  { %447 = vmatprep.subr.mxu0 %v597_v0  ;;  %452 = vmatprep.subr.mxu1 %v597_v0  ;;  %s540_s26 = scalar_lea.vmem %s407_s25, 256  ;;  %p545_p11 = scmp.lt.s32.totalorder %s407_s25, %s407_s25 }
  0x3c   :  { %p541_p10 = scmp.ne.s32.totalorder %s407_s25, %s540_s26  ;;  %p546_p12 = scmp.lt.s32.totalorder %s540_s26, %s540_s26 }
  0x3d   :  { %440 = vmatmul.mubr.msk.f32.vlgmr.msra.gmra.mrb[0].mxu0 %vm67_vm1, %v65_v4  ;;  %445 = vmatmul.mubr.msk.f32.vlgmr.msra.gmra.mrb[0].mxu1 %vm67_vm1, %v66_v6 }
  0x3e   :  { %449 = vmatprep.mubr.msk.f32.mxu0 %vm598_vm0, %v597_v0  ;;  %454 = vmatprep.mubr.msk.f32.mxu1 %vm598_vm0, %v597_v0  ;;  %p547_p13 = por %p546_p12, %p545_p11 }
  0x3f   :  { %448 = vmatpush3.msra.mxu0 %v63_v17  ;;  %453 = vmatpush3.msra.mxu1 %v64_v18 }
  0x40   :  { %p548_p0 = pnand %p547_p13, %p541_p10 }
 0x110   :  { %v140_v7 = vpop.f32.mrb[0].mxu0  ;;  %v216_v8 = vpop.f32.mrb[0].mxu1 }
 0x111   :  { %v220_v9 = vmul.f32 1.442695, %v140_v7  ;;  %v441_v10 = vpop.f32.mrb[1].mxu0  ;;  %v222_v11 = vmul.f32 1.442695, %v216_v8  ;;  %v446_v12 = vpop.f32.mrb[1].mxu1 }
 0x113   :  { %466 = vpow2.f32 %v220_v9 }
 0x114   :  { %468 = vpow2.f32 %v222_v11 }
 0x11d   :  { %v467_v13 = vpop.eup %466 }
 0x11e   :  { %v469_v14 = vpop.eup %468  ;;  %v225_v15 = vsel %vm224_vm2, %v467_v13, 0.0 }
 0x11f   :  { %226 = vadd.xlane.f32.xlu0 %v225_v15  ;;  %v228_v16 = vsel %vm224_vm2, %v469_v14, 0.0 }
 0x123   :  { %229 = vadd.xlane.f32.xlu0 %v228_v16 }
 0x1ac   :  { %v227_v19 = vpop.xlane.xlu0 %226 }
 0x1ad   :  { %v231_v20 = vadd.f32 1e-08, %v227_v19 }
 0x1af   :  { %470 = vrcp.f32 %v231_v20 }
 0x1b0   :  { %v230_v21 = vpop.xlane.xlu0 %229 }
 0x1b1   :  { %v232_v22 = vadd.f32 1e-08, %v230_v21 }
 0x1b3   :  { %472 = vrcp.f32 %v232_v22 }
 0x1b9   :  { %v471_v23 = vpop.eup %470 }
 0x1ba   :  { %v237_v24 = vmul.f32 %v471_v23, %v467_v13 }
 0x1bc   :  { %450 = vmatmul.mubr.msk.f32.vlgmr.msra.gmra.mrb[2].mxu0 %vm224_vm2, %v237_v24  ;;  %387 = vst.msk [vmem:[#allocation9] sm:$0xff] %vm224_vm2, %v237_v24 }
 0x1bd   :  { %v473_v25 = vpop.eup %472 }
 0x1be   :  { %v238_v26 = vmul.f32 %v473_v25, %v469_v14 }
 0x1c0   :  { %388 = vst.msk [vmem:[#allocation9 + $0x8] sm:$0xff] %vm224_vm2, %v238_v26  ;;  %455 = vmatmul.mubr.msk.f32.vlgmr.msra.gmra.mrb[2].mxu1 %vm224_vm2, %v238_v26 }
 0x1c1   :  { %551 = shalt.err (!%p548_p0)
}
 0x1c2   :  { %s552_s5 = scalar_lea.hbm %s728_s4, 256 }
 0x1c3   :  { %p553_p1 = scmp.ne.s32.totalorder %s728_s4, %s552_s5  ;;  %p556_p2 = scmp.lt.u32.totalorder %s552_s5, %s728_s4 }
 0x1c5   :  { %p558_p3 = pnand %p556_p2, %p553_p1 }
 0x1c7   :  { %561 = shalt.err (!%p558_p3)
}
 0x1c8   :  { %412 = dma.vmem_to_hbm [thread:$0]  %s407_s25, 256, %s728_s4, [#allocation10], %s594_s27, %s594_s27, %s595_s28  }
 0x1c9   :  { %s600_s12 = smov [#allocation8]  }
 0x1ca   :  { %s394_s1 = sshll.u32 %s600_s12, 4  ;;  %s395_s1 = int_to_ptr.vmem [resolvable:$true] %s394_s1 }
 0x1cb   :  { %s562_s13 = scalar_lea.vmem %s395_s1, 256  ;;  %p567_p5 = scmp.lt.s32.totalorder %s395_s1, %s395_s1 }
 0x1cc   :  { %p563_p4 = scmp.ne.s32.totalorder %s395_s1, %s562_s13  ;;  %p568_p6 = scmp.lt.s32.totalorder %s562_s13, %s562_s13 }
 0x1ce   :  { %p569_p7 = por %p568_p6, %p567_p5 }
 0x1d0   :  { %p570_p8 = pnand %p569_p7, %p563_p4 }
 0x28f   :  { %v308_v27 = vpop.f32.mrb[2].mxu0 }
 0x290   :  { %385 = vst.msk [vmem:[#allocation8] sm:$0xff] %vm67_vm1, %v308_v27  ;;  %v451_v28 = vpop.f32.mrb[3].mxu0 }
 0x293   :  { %v381_v29 = vpop.f32.mrb[2].mxu1 }
 0x294   :  { %386 = vst.msk [vmem:[#allocation8 + $0x8] sm:$0xff] %vm67_vm1, %v381_v29  ;;  %v456_v30 = vpop.f32.mrb[3].mxu1 }
 0x295   :  { %573 = shalt.err (!%p570_p8)
}
 0x296   :  { %s574_s15 = scalar_lea.hbm %s727_s3, 256 }
 0x297   :  { %p575_p9 = scmp.ne.s32.totalorder %s727_s3, %s574_s15  ;;  %p578_p10 = scmp.lt.u32.totalorder %s574_s15, %s727_s3 }
 0x299   :  { %p580_p11 = pnand %p578_p10, %p575_p9 }
 0x29b   :  { %583 = shalt.err (!%p580_p11)
}
 0x29c   :  { %400 = dma.vmem_to_hbm [thread:$0]  %s395_s1, 256, %s727_s3, [#allocation4], %s594_s27, %s594_s27, %s595_s28  }
 0x29d   :  { %588 = dma.done.wait [#allocation4], 256  }
 0x29e   :  { %589 = vsyncadd [#allocation4], 4294967040 }
 0x29f   :  { %590 = dma.done.wait [#allocation10], 256  }
 0x2a0   :  { %591 = vsyncadd [#allocation10], 4294967040 }
 0x2a1   :  { %419 = vsyncpa [#allocation3], 1 }
 0x2a2   :  { %420 = vsyncpa [#allocation6], 1 }
 0x2a3   :  { %421 = vsyncpa [#allocation4], 1 }
 0x2a4   :  { %422 = vsyncpa [#allocation10], 1 }

</bundles_post_ra>
